<compile_context>
chip_gen: v6e
topology: v6e:2x2x1
jax: 0.10.0
libtpu: 0.0.40
codegen_flags: <defaults>
</compile_context>

<pallas_src>
import jax
import jax.numpy as jnp
from jax.experimental import pallas as pl
from jax.experimental.pallas import tpu as pltpu


def _round_up(x, m):
    return ((x + m - 1) // m) * m


def _log_softmax_axis0(h):
    # Numerically-stable log_softmax over the feature axis (axis 0).
    # Batch sits on lanes -> EUP/VPU work is 128-lane dense; the axis-0
    # reduction only spans a handful of sublanes.
    m = jnp.max(h, axis=0, keepdims=True)
    s = h - m
    lse = jnp.log(jnp.sum(jnp.exp(s), axis=0, keepdims=True))
    return s - lse


def mlp_kernel(x_ref,
               w1_ref, b1_ref,
               w2_ref, b2_ref,
               w3_ref, b3_ref,
               w4_ref, b4_ref,
               o_ref):
    """Fused forward for one batch tile. Activations are (features, TB)."""
    tb = x_ref.shape[1]

    def linear_mxu(h, w_ref, b_ref):
        # (n_out, n_in) @ (n_in, TB) with f32 accumulation on the MXU.
        return jnp.dot(w_ref[...], h, preferred_element_type=jnp.float32) + b_ref[...]

    def linear_fma(h, w_ref, b_ref):
        # Tiny contraction dims (16/6/3): unrolled VPU broadcast-FMA over full
        # 128-lane vregs; avoids MXU push/pop latency for micro-matmuls.
        n_out, n_in = w_ref.shape
        w = w_ref[...]
        acc = jnp.broadcast_to(b_ref[...], (n_out, tb)).astype(jnp.float32)
        for k in range(n_in):
            acc = acc + w[:, k:k + 1] * h[k:k + 1, :]
        return acc

    h = x_ref[...].astype(jnp.float32)                        # (n_feature, TB)
    h = _log_softmax_axis0(linear_mxu(h, w1_ref, b1_ref))     # (n_hidden,  TB)
    h = _log_softmax_axis0(linear_fma(h, w2_ref, b2_ref))     # (6,         TB)
    h = _log_softmax_axis0(linear_fma(h, w3_ref, b3_ref))     # (3,         TB)
    o_ref[...] = linear_fma(h, w4_ref, b4_ref).astype(o_ref.dtype)  # (n_output, TB)


def net_forward(x, params, *, tb=None):
    """x: (batch, n_feature) f32.  params: w1..w4 (out, in), b1..b4 (out, 1)."""
    batch, n_feature = x.shape
    w1, b1 = params["w1"], params["b1"]
    w2, b2 = params["w2"], params["b2"]
    w3, b3 = params["w3"], params["b3"]
    w4, b4 = params["w4"], params["b4"]
    n_hidden = w1.shape[0]
    n_h2 = w2.shape[0]
    n_h3 = w3.shape[0]
    n_output = w4.shape[0]

    if tb is None:
        tb = min(1024, _round_up(max(batch, 1), 128))
    tb = _round_up(tb, 128)
    padded = _round_up(batch, tb)

    # Feature-major: batch on the lane axis; pad batch to a tile multiple.
    # Padded columns only produce garbage in discarded output columns.
    x_t = jnp.pad(x.T, ((0, 0), (0, padded - batch)))

    tile = lambda i: (0, i)        # x / out: walk the batch (lane) axis
    resident = lambda i: (0, 0)    # weights / biases: same block every step

    out_t = pl.pallas_call(
        mlp_kernel,
        out_shape=jax.ShapeDtypeStruct((n_output, padded), jnp.float32),
        grid=(padded // tb,),
        in_specs=[
            pl.BlockSpec((n_feature, tb), tile),
            pl.BlockSpec((n_hidden, n_feature), resident),
            pl.BlockSpec((n_hidden, 1), resident),
            pl.BlockSpec((n_h2, n_hidden), resident),
            pl.BlockSpec((n_h2, 1), resident),
            pl.BlockSpec((n_h3, n_h2), resident),
            pl.BlockSpec((n_h3, 1), resident),
            pl.BlockSpec((n_output, n_h3), resident),
            pl.BlockSpec((n_output, 1), resident),
        ],
        out_specs=pl.BlockSpec((n_output, tb), tile),
        compiler_params=pltpu.CompilerParams(
            dimension_semantics=("parallel",),          # 2x on v7x (2 TCs)
            vmem_limit_bytes=32 * 1024 * 1024,          # tiles + weights << 32 MiB
        ),
    )(x_t, w1, b1, w2, b2, w3, b3, w4, b4)

    return out_t[:, :batch].T


def init_params(key, n_feature, n_hidden, n_output):
    """Deterministic synthetic parameters in PyTorch Linear layout: W (out, in)."""
    dims = [(n_feature, n_hidden), (n_hidden, 6), (6, 3), (3, n_output)]
    params = {}
    for i, (fan_in, fan_out) in enumerate(dims, start=1):
        key, kw, kb = jax.random.split(key, 3)
        bound = 1.0 / jnp.sqrt(fan_in)
        params[f"w{i}"] = jax.random.uniform(
            kw, (fan_out, fan_in), jnp.float32, -bound, bound)
        params[f"b{i}"] = jax.random.uniform(
            kb, (fan_out, 1), jnp.float32, -bound, bound)
    return params


def reference_forward(x, params):
    h = x
    for i in (1, 2, 3):
        h = jax.nn.log_softmax(h @ params[f"w{i}"].T + params[f"b{i}"].T, axis=-1)
    return h @ params["w4"].T + params["b4"].T


if __name__ == "__main__":
    n_feature, n_hidden, n_output = 32, 16, 4
    batch = 8

    key = jax.random.PRNGKey(0)
    key, kx = jax.random.split(key)
    x = jax.random.normal(kx, (batch, n_feature), jnp.float32)
    params = init_params(key, n_feature, n_hidden, n_output)

    out = net_forward(x, params)
    out = jax.block_until_ready(out)

    ref = reference_forward(x, params)
    assert out.shape == (batch, n_output)
    assert jnp.allclose(out, ref, atol=1e-4, rtol=1e-4), "mismatch vs JAX reference"

    print("KERNEL_OK")
</pallas_src>

<mosaic_0001>
module attributes {stable_mosaic.version = 11 : i64} {
  func.func @mlp_kernel(%arg0: i32, %arg1: memref<32x128xf32, #tpu.memory_space<vmem>>, %arg2: memref<16x32xf32, #tpu.memory_space<vmem>>, %arg3: memref<16x1xf32, #tpu.memory_space<vmem>>, %arg4: memref<6x16xf32, #tpu.memory_space<vmem>>, %arg5: memref<6x1xf32, #tpu.memory_space<vmem>>, %arg6: memref<3x6xf32, #tpu.memory_space<vmem>>, %arg7: memref<3x1xf32, #tpu.memory_space<vmem>>, %arg8: memref<4x3xf32, #tpu.memory_space<vmem>>, %arg9: memref<4x1xf32, #tpu.memory_space<vmem>>, %arg10: memref<4x128xf32, #tpu.memory_space<vmem>>) attributes {dimension_semantics = [#tpu.dimension_semantics<parallel>], iteration_bounds = array<i64: 1>, scalar_prefetch = 0 : i64, scratch_operands = 0 : i64, tpu.core_type = #tpu.core_type<tc>, window_params = [{transform_indices = @transform_0, window_bounds = array<i64: 32, 128>}, {pipeline_mode = #tpu.pipeline_mode<synchronous>, transform_indices = @transform_1, window_bounds = array<i64: 16, 32>}, {pipeline_mode = #tpu.pipeline_mode<synchronous>, transform_indices = @transform_2, window_bounds = array<i64: 16, 1>}, {pipeline_mode = #tpu.pipeline_mode<synchronous>, transform_indices = @transform_3, window_bounds = array<i64: 6, 16>}, {pipeline_mode = #tpu.pipeline_mode<synchronous>, transform_indices = @transform_4, window_bounds = array<i64: 6, 1>}, {pipeline_mode = #tpu.pipeline_mode<synchronous>, transform_indices = @transform_5, window_bounds = array<i64: 3, 6>}, {pipeline_mode = #tpu.pipeline_mode<synchronous>, transform_indices = @transform_6, window_bounds = array<i64: 3, 1>}, {pipeline_mode = #tpu.pipeline_mode<synchronous>, transform_indices = @transform_7, window_bounds = array<i64: 4, 3>}, {pipeline_mode = #tpu.pipeline_mode<synchronous>, transform_indices = @transform_8, window_bounds = array<i64: 4, 1>}, {transform_indices = @transform_9, window_bounds = array<i64: 4, 128>}]} {
    %c0 = arith.constant 0 : index
    %c0_0 = arith.constant 0 : index
    %0 = vector.load %arg1[%c0, %c0_0] : memref<32x128xf32, #tpu.memory_space<vmem>>, vector<32x128xf32>
    %c0_1 = arith.constant 0 : index
    %c0_2 = arith.constant 0 : index
    %1 = vector.load %arg2[%c0_1, %c0_2] : memref<16x32xf32, #tpu.memory_space<vmem>>, vector<16x32xf32>
    %cst = arith.constant dense<0.000000e+00> : vector<16x128xf32>
    %2 = tpu.matmul %1, %0, %cst {dimension_numbers = #tpu.dot_dimension_numbers<[1], [0], [0], [1], [0, 0, 1, 1], [], []>} : vector<16x32xf32>, vector<32x128xf32>, vector<16x128xf32> -> vector<16x128xf32>
    %c0_3 = arith.constant 0 : index
    %c0_4 = arith.constant 0 : index
    %3 = vector.load %arg3[%c0_3, %c0_4] : memref<16x1xf32, #tpu.memory_space<vmem>>, vector<16x1xf32>
    %4 = vector.broadcast %3 : vector<16x1xf32> to vector<16x128xf32>
    %5 = arith.addf %2, %4 : vector<16x128xf32>
    %cst_5 = arith.constant dense<0xFF800000> : vector<128xf32>
    %6 = vector.multi_reduction <maximumf>, %5, %cst_5 [0] : vector<16x128xf32> to vector<128xf32>
    %7 = vector.shape_cast %6 : vector<128xf32> to vector<1x128xf32>
    %8 = vector.broadcast %7 : vector<1x128xf32> to vector<16x128xf32>
    %9 = arith.subf %5, %8 : vector<16x128xf32>
    %10 = math.exp %9 : vector<16x128xf32>
    %cst_6 = arith.constant dense<0.000000e+00> : vector<128xf32>
    %11 = vector.multi_reduction <add>, %10, %cst_6 [0] : vector<16x128xf32> to vector<128xf32>
    %12 = vector.shape_cast %11 : vector<128xf32> to vector<1x128xf32>
    %13 = math.log %12 : vector<1x128xf32>
    %14 = vector.broadcast %13 : vector<1x128xf32> to vector<16x128xf32>
    %15 = arith.subf %9, %14 : vector<16x128xf32>
    %c0_7 = arith.constant 0 : index
    %c0_8 = arith.constant 0 : index
    %16 = vector.load %arg4[%c0_7, %c0_8] : memref<6x16xf32, #tpu.memory_space<vmem>>, vector<6x16xf32>
    %c0_9 = arith.constant 0 : index
    %c0_10 = arith.constant 0 : index
    %17 = vector.load %arg5[%c0_9, %c0_10] : memref<6x1xf32, #tpu.memory_space<vmem>>, vector<6x1xf32>
    %18 = vector.shape_cast %17 : vector<6x1xf32> to vector<6x1xf32>
    %19 = vector.broadcast %18 : vector<6x1xf32> to vector<6x128xf32>
    %20 = vector.extract_strided_slice %16 {offsets = [0, 0], sizes = [6, 1], strides = [1, 1]} : vector<6x16xf32> to vector<6x1xf32>
    %21 = vector.extract_strided_slice %15 {offsets = [0, 0], sizes = [1, 128], strides = [1, 1]} : vector<16x128xf32> to vector<1x128xf32>
    %22 = vector.broadcast %20 : vector<6x1xf32> to vector<6x128xf32>
    %23 = vector.broadcast %21 : vector<1x128xf32> to vector<6x128xf32>
    %24 = arith.mulf %22, %23 : vector<6x128xf32>
    %25 = arith.addf %19, %24 : vector<6x128xf32>
    %26 = vector.extract_strided_slice %16 {offsets = [0, 1], sizes = [6, 1], strides = [1, 1]} : vector<6x16xf32> to vector<6x1xf32>
    %27 = vector.extract_strided_slice %15 {offsets = [1, 0], sizes = [1, 128], strides = [1, 1]} : vector<16x128xf32> to vector<1x128xf32>
    %28 = vector.broadcast %26 : vector<6x1xf32> to vector<6x128xf32>
    %29 = vector.broadcast %27 : vector<1x128xf32> to vector<6x128xf32>
    %30 = arith.mulf %28, %29 : vector<6x128xf32>
    %31 = arith.addf %25, %30 : vector<6x128xf32>
    %32 = vector.extract_strided_slice %16 {offsets = [0, 2], sizes = [6, 1], strides = [1, 1]} : vector<6x16xf32> to vector<6x1xf32>
    %33 = vector.extract_strided_slice %15 {offsets = [2, 0], sizes = [1, 128], strides = [1, 1]} : vector<16x128xf32> to vector<1x128xf32>
    %34 = vector.broadcast %32 : vector<6x1xf32> to vector<6x128xf32>
    %35 = vector.broadcast %33 : vector<1x128xf32> to vector<6x128xf32>
    %36 = arith.mulf %34, %35 : vector<6x128xf32>
    %37 = arith.addf %31, %36 : vector<6x128xf32>
    %38 = vector.extract_strided_slice %16 {offsets = [0, 3], sizes = [6, 1], strides = [1, 1]} : vector<6x16xf32> to vector<6x1xf32>
    %39 = vector.extract_strided_slice %15 {offsets = [3, 0], sizes = [1, 128], strides = [1, 1]} : vector<16x128xf32> to vector<1x128xf32>
    %40 = vector.broadcast %38 : vector<6x1xf32> to vector<6x128xf32>
    %41 = vector.broadcast %39 : vector<1x128xf32> to vector<6x128xf32>
    %42 = arith.mulf %40, %41 : vector<6x128xf32>
    %43 = arith.addf %37, %42 : vector<6x128xf32>
    %44 = vector.extract_strided_slice %16 {offsets = [0, 4], sizes = [6, 1], strides = [1, 1]} : vector<6x16xf32> to vector<6x1xf32>
    %45 = vector.extract_strided_slice %15 {offsets = [4, 0], sizes = [1, 128], strides = [1, 1]} : vector<16x128xf32> to vector<1x128xf32>
    %46 = vector.broadcast %44 : vector<6x1xf32> to vector<6x128xf32>
    %47 = vector.broadcast %45 : vector<1x128xf32> to vector<6x128xf32>
    %48 = arith.mulf %46, %47 : vector<6x128xf32>
    %49 = arith.addf %43, %48 : vector<6x128xf32>
    %50 = vector.extract_strided_slice %16 {offsets = [0, 5], sizes = [6, 1], strides = [1, 1]} : vector<6x16xf32> to vector<6x1xf32>
    %51 = vector.extract_strided_slice %15 {offsets = [5, 0], sizes = [1, 128], strides = [1, 1]} : vector<16x128xf32> to vector<1x128xf32>
    %52 = vector.broadcast %50 : vector<6x1xf32> to vector<6x128xf32>
    %53 = vector.broadcast %51 : vector<1x128xf32> to vector<6x128xf32>
    %54 = arith.mulf %52, %53 : vector<6x128xf32>
    %55 = arith.addf %49, %54 : vector<6x128xf32>
    %56 = vector.extract_strided_slice %16 {offsets = [0, 6], sizes = [6, 1], strides = [1, 1]} : vector<6x16xf32> to vector<6x1xf32>
    %57 = vector.extract_strided_slice %15 {offsets = [6, 0], sizes = [1, 128], strides = [1, 1]} : vector<16x128xf32> to vector<1x128xf32>
    %58 = vector.broadcast %56 : vector<6x1xf32> to vector<6x128xf32>
    %59 = vector.broadcast %57 : vector<1x128xf32> to vector<6x128xf32>
    %60 = arith.mulf %58, %59 : vector<6x128xf32>
    %61 = arith.addf %55, %60 : vector<6x128xf32>
    %62 = vector.extract_strided_slice %16 {offsets = [0, 7], sizes = [6, 1], strides = [1, 1]} : vector<6x16xf32> to vector<6x1xf32>
    %63 = vector.extract_strided_slice %15 {offsets = [7, 0], sizes = [1, 128], strides = [1, 1]} : vector<16x128xf32> to vector<1x128xf32>
    %64 = vector.broadcast %62 : vector<6x1xf32> to vector<6x128xf32>
    %65 = vector.broadcast %63 : vector<1x128xf32> to vector<6x128xf32>
    %66 = arith.mulf %64, %65 : vector<6x128xf32>
    %67 = arith.addf %61, %66 : vector<6x128xf32>
    %68 = vector.extract_strided_slice %16 {offsets = [0, 8], sizes = [6, 1], strides = [1, 1]} : vector<6x16xf32> to vector<6x1xf32>
    %69 = vector.extract_strided_slice %15 {offsets = [8, 0], sizes = [1, 128], strides = [1, 1]} : vector<16x128xf32> to vector<1x128xf32>
    %70 = vector.broadcast %68 : vector<6x1xf32> to vector<6x128xf32>
    %71 = vector.broadcast %69 : vector<1x128xf32> to vector<6x128xf32>
    %72 = arith.mulf %70, %71 : vector<6x128xf32>
    %73 = arith.addf %67, %72 : vector<6x128xf32>
    %74 = vector.extract_strided_slice %16 {offsets = [0, 9], sizes = [6, 1], strides = [1, 1]} : vector<6x16xf32> to vector<6x1xf32>
    %75 = vector.extract_strided_slice %15 {offsets = [9, 0], sizes = [1, 128], strides = [1, 1]} : vector<16x128xf32> to vector<1x128xf32>
    %76 = vector.broadcast %74 : vector<6x1xf32> to vector<6x128xf32>
    %77 = vector.broadcast %75 : vector<1x128xf32> to vector<6x128xf32>
    %78 = arith.mulf %76, %77 : vector<6x128xf32>
    %79 = arith.addf %73, %78 : vector<6x128xf32>
    %80 = vector.extract_strided_slice %16 {offsets = [0, 10], sizes = [6, 1], strides = [1, 1]} : vector<6x16xf32> to vector<6x1xf32>
    %81 = vector.extract_strided_slice %15 {offsets = [10, 0], sizes = [1, 128], strides = [1, 1]} : vector<16x128xf32> to vector<1x128xf32>
    %82 = vector.broadcast %80 : vector<6x1xf32> to vector<6x128xf32>
    %83 = vector.broadcast %81 : vector<1x128xf32> to vector<6x128xf32>
    %84 = arith.mulf %82, %83 : vector<6x128xf32>
    %85 = arith.addf %79, %84 : vector<6x128xf32>
    %86 = vector.extract_strided_slice %16 {offsets = [0, 11], sizes = [6, 1], strides = [1, 1]} : vector<6x16xf32> to vector<6x1xf32>
    %87 = vector.extract_strided_slice %15 {offsets = [11, 0], sizes = [1, 128], strides = [1, 1]} : vector<16x128xf32> to vector<1x128xf32>
    %88 = vector.broadcast %86 : vector<6x1xf32> to vector<6x128xf32>
    %89 = vector.broadcast %87 : vector<1x128xf32> to vector<6x128xf32>
    %90 = arith.mulf %88, %89 : vector<6x128xf32>
    %91 = arith.addf %85, %90 : vector<6x128xf32>
    %92 = vector.extract_strided_slice %16 {offsets = [0, 12], sizes = [6, 1], strides = [1, 1]} : vector<6x16xf32> to vector<6x1xf32>
    %93 = vector.extract_strided_slice %15 {offsets = [12, 0], sizes = [1, 128], strides = [1, 1]} : vector<16x128xf32> to vector<1x128xf32>
    %94 = vector.broadcast %92 : vector<6x1xf32> to vector<6x128xf32>
    %95 = vector.broadcast %93 : vector<1x128xf32> to vector<6x128xf32>
    %96 = arith.mulf %94, %95 : vector<6x128xf32>
    %97 = arith.addf %91, %96 : vector<6x128xf32>
    %98 = vector.extract_strided_slice %16 {offsets = [0, 13], sizes = [6, 1], strides = [1, 1]} : vector<6x16xf32> to vector<6x1xf32>
    %99 = vector.extract_strided_slice %15 {offsets = [13, 0], sizes = [1, 128], strides = [1, 1]} : vector<16x128xf32> to vector<1x128xf32>
    %100 = vector.broadcast %98 : vector<6x1xf32> to vector<6x128xf32>
    %101 = vector.broadcast %99 : vector<1x128xf32> to vector<6x128xf32>
    %102 = arith.mulf %100, %101 : vector<6x128xf32>
    %103 = arith.addf %97, %102 : vector<6x128xf32>
    %104 = vector.extract_strided_slice %16 {offsets = [0, 14], sizes = [6, 1], strides = [1, 1]} : vector<6x16xf32> to vector<6x1xf32>
    %105 = vector.extract_strided_slice %15 {offsets = [14, 0], sizes = [1, 128], strides = [1, 1]} : vector<16x128xf32> to vector<1x128xf32>
    %106 = vector.broadcast %104 : vector<6x1xf32> to vector<6x128xf32>
    %107 = vector.broadcast %105 : vector<1x128xf32> to vector<6x128xf32>
    %108 = arith.mulf %106, %107 : vector<6x128xf32>
    %109 = arith.addf %103, %108 : vector<6x128xf32>
    %110 = vector.extract_strided_slice %16 {offsets = [0, 15], sizes = [6, 1], strides = [1, 1]} : vector<6x16xf32> to vector<6x1xf32>
    %111 = vector.extract_strided_slice %15 {offsets = [15, 0], sizes = [1, 128], strides = [1, 1]} : vector<16x128xf32> to vector<1x128xf32>
    %112 = vector.broadcast %110 : vector<6x1xf32> to vector<6x128xf32>
    %113 = vector.broadcast %111 : vector<1x128xf32> to vector<6x128xf32>
    %114 = arith.mulf %112, %113 : vector<6x128xf32>
    %115 = arith.addf %109, %114 : vector<6x128xf32>
    %cst_11 = arith.constant dense<0xFF800000> : vector<128xf32>
    %116 = vector.multi_reduction <maximumf>, %115, %cst_11 [0] : vector<6x128xf32> to vector<128xf32>
    %117 = vector.shape_cast %116 : vector<128xf32> to vector<1x128xf32>
    %118 = vector.broadcast %117 : vector<1x128xf32> to vector<6x128xf32>
    %119 = arith.subf %115, %118 : vector<6x128xf32>
    %120 = math.exp %119 : vector<6x128xf32>
    %cst_12 = arith.constant dense<0.000000e+00> : vector<128xf32>
    %121 = vector.multi_reduction <add>, %120, %cst_12 [0] : vector<6x128xf32> to vector<128xf32>
    %122 = vector.shape_cast %121 : vector<128xf32> to vector<1x128xf32>
    %123 = math.log %122 : vector<1x128xf32>
    %124 = vector.broadcast %123 : vector<1x128xf32> to vector<6x128xf32>
    %125 = arith.subf %119, %124 : vector<6x128xf32>
    %c0_13 = arith.constant 0 : index
    %c0_14 = arith.constant 0 : index
    %126 = vector.load %arg6[%c0_13, %c0_14] : memref<3x6xf32, #tpu.memory_space<vmem>>, vector<3x6xf32>
    %c0_15 = arith.constant 0 : index
    %c0_16 = arith.constant 0 : index
    %127 = vector.load %arg7[%c0_15, %c0_16] : memref<3x1xf32, #tpu.memory_space<vmem>>, vector<3x1xf32>
    %128 = vector.shape_cast %127 : vector<3x1xf32> to vector<3x1xf32>
    %129 = vector.broadcast %128 : vector<3x1xf32> to vector<3x128xf32>
    %130 = vector.extract_strided_slice %126 {offsets = [0, 0], sizes = [3, 1], strides = [1, 1]} : vector<3x6xf32> to vector<3x1xf32>
    %131 = vector.extract_strided_slice %125 {offsets = [0, 0], sizes = [1, 128], strides = [1, 1]} : vector<6x128xf32> to vector<1x128xf32>
    %132 = vector.broadcast %130 : vector<3x1xf32> to vector<3x128xf32>
    %133 = vector.broadcast %131 : vector<1x128xf32> to vector<3x128xf32>
    %134 = arith.mulf %132, %133 : vector<3x128xf32>
    %135 = arith.addf %129, %134 : vector<3x128xf32>
    %136 = vector.extract_strided_slice %126 {offsets = [0, 1], sizes = [3, 1], strides = [1, 1]} : vector<3x6xf32> to vector<3x1xf32>
    %137 = vector.extract_strided_slice %125 {offsets = [1, 0], sizes = [1, 128], strides = [1, 1]} : vector<6x128xf32> to vector<1x128xf32>
    %138 = vector.broadcast %136 : vector<3x1xf32> to vector<3x128xf32>
    %139 = vector.broadcast %137 : vector<1x128xf32> to vector<3x128xf32>
    %140 = arith.mulf %138, %139 : vector<3x128xf32>
    %141 = arith.addf %135, %140 : vector<3x128xf32>
    %142 = vector.extract_strided_slice %126 {offsets = [0, 2], sizes = [3, 1], strides = [1, 1]} : vector<3x6xf32> to vector<3x1xf32>
    %143 = vector.extract_strided_slice %125 {offsets = [2, 0], sizes = [1, 128], strides = [1, 1]} : vector<6x128xf32> to vector<1x128xf32>
    %144 = vector.broadcast %142 : vector<3x1xf32> to vector<3x128xf32>
    %145 = vector.broadcast %143 : vector<1x128xf32> to vector<3x128xf32>
    %146 = arith.mulf %144, %145 : vector<3x128xf32>
    %147 = arith.addf %141, %146 : vector<3x128xf32>
    %148 = vector.extract_strided_slice %126 {offsets = [0, 3], sizes = [3, 1], strides = [1, 1]} : vector<3x6xf32> to vector<3x1xf32>
    %149 = vector.extract_strided_slice %125 {offsets = [3, 0], sizes = [1, 128], strides = [1, 1]} : vector<6x128xf32> to vector<1x128xf32>
    %150 = vector.broadcast %148 : vector<3x1xf32> to vector<3x128xf32>
    %151 = vector.broadcast %149 : vector<1x128xf32> to vector<3x128xf32>
    %152 = arith.mulf %150, %151 : vector<3x128xf32>
    %153 = arith.addf %147, %152 : vector<3x128xf32>
    %154 = vector.extract_strided_slice %126 {offsets = [0, 4], sizes = [3, 1], strides = [1, 1]} : vector<3x6xf32> to vector<3x1xf32>
    %155 = vector.extract_strided_slice %125 {offsets = [4, 0], sizes = [1, 128], strides = [1, 1]} : vector<6x128xf32> to vector<1x128xf32>
    %156 = vector.broadcast %154 : vector<3x1xf32> to vector<3x128xf32>
    %157 = vector.broadcast %155 : vector<1x128xf32> to vector<3x128xf32>
    %158 = arith.mulf %156, %157 : vector<3x128xf32>
    %159 = arith.addf %153, %158 : vector<3x128xf32>
    %160 = vector.extract_strided_slice %126 {offsets = [0, 5], sizes = [3, 1], strides = [1, 1]} : vector<3x6xf32> to vector<3x1xf32>
    %161 = vector.extract_strided_slice %125 {offsets = [5, 0], sizes = [1, 128], strides = [1, 1]} : vector<6x128xf32> to vector<1x128xf32>
    %162 = vector.broadcast %160 : vector<3x1xf32> to vector<3x128xf32>
    %163 = vector.broadcast %161 : vector<1x128xf32> to vector<3x128xf32>
    %164 = arith.mulf %162, %163 : vector<3x128xf32>
    %165 = arith.addf %159, %164 : vector<3x128xf32>
    %cst_17 = arith.constant dense<0xFF800000> : vector<128xf32>
    %166 = vector.multi_reduction <maximumf>, %165, %cst_17 [0] : vector<3x128xf32> to vector<128xf32>
    %167 = vector.shape_cast %166 : vector<128xf32> to vector<1x128xf32>
    %168 = vector.broadcast %167 : vector<1x128xf32> to vector<3x128xf32>
    %169 = arith.subf %165, %168 : vector<3x128xf32>
    %170 = math.exp %169 : vector<3x128xf32>
    %cst_18 = arith.constant dense<0.000000e+00> : vector<128xf32>
    %171 = vector.multi_reduction <add>, %170, %cst_18 [0] : vector<3x128xf32> to vector<128xf32>
    %172 = vector.shape_cast %171 : vector<128xf32> to vector<1x128xf32>
    %173 = math.log %172 : vector<1x128xf32>
    %174 = vector.broadcast %173 : vector<1x128xf32> to vector<3x128xf32>
    %175 = arith.subf %169, %174 : vector<3x128xf32>
    %c0_19 = arith.constant 0 : index
    %c0_20 = arith.constant 0 : index
    %176 = vector.load %arg8[%c0_19, %c0_20] : memref<4x3xf32, #tpu.memory_space<vmem>>, vector<4x3xf32>
    %c0_21 = arith.constant 0 : index
    %c0_22 = arith.constant 0 : index
    %177 = vector.load %arg9[%c0_21, %c0_22] : memref<4x1xf32, #tpu.memory_space<vmem>>, vector<4x1xf32>
    %178 = vector.shape_cast %177 : vector<4x1xf32> to vector<4x1xf32>
    %179 = vector.broadcast %178 : vector<4x1xf32> to vector<4x128xf32>
    %180 = vector.extract_strided_slice %176 {offsets = [0, 0], sizes = [4, 1], strides = [1, 1]} : vector<4x3xf32> to vector<4x1xf32>
    %181 = vector.extract_strided_slice %175 {offsets = [0, 0], sizes = [1, 128], strides = [1, 1]} : vector<3x128xf32> to vector<1x128xf32>
    %182 = vector.broadcast %180 : vector<4x1xf32> to vector<4x128xf32>
    %183 = vector.broadcast %181 : vector<1x128xf32> to vector<4x128xf32>
    %184 = arith.mulf %182, %183 : vector<4x128xf32>
    %185 = arith.addf %179, %184 : vector<4x128xf32>
    %186 = vector.extract_strided_slice %176 {offsets = [0, 1], sizes = [4, 1], strides = [1, 1]} : vector<4x3xf32> to vector<4x1xf32>
    %187 = vector.extract_strided_slice %175 {offsets = [1, 0], sizes = [1, 128], strides = [1, 1]} : vector<3x128xf32> to vector<1x128xf32>
    %188 = vector.broadcast %186 : vector<4x1xf32> to vector<4x128xf32>
    %189 = vector.broadcast %187 : vector<1x128xf32> to vector<4x128xf32>
    %190 = arith.mulf %188, %189 : vector<4x128xf32>
    %191 = arith.addf %185, %190 : vector<4x128xf32>
    %192 = vector.extract_strided_slice %176 {offsets = [0, 2], sizes = [4, 1], strides = [1, 1]} : vector<4x3xf32> to vector<4x1xf32>
    %193 = vector.extract_strided_slice %175 {offsets = [2, 0], sizes = [1, 128], strides = [1, 1]} : vector<3x128xf32> to vector<1x128xf32>
    %194 = vector.broadcast %192 : vector<4x1xf32> to vector<4x128xf32>
    %195 = vector.broadcast %193 : vector<1x128xf32> to vector<4x128xf32>
    %196 = arith.mulf %194, %195 : vector<4x128xf32>
    %197 = arith.addf %191, %196 : vector<4x128xf32>
    %c0_23 = arith.constant 0 : index
    %c0_24 = arith.constant 0 : index
    %198 = vector.load %arg10[%c0_23, %c0_24] : memref<4x128xf32, #tpu.memory_space<vmem>>, vector<4x128xf32>
    tpu.vector_store %arg10[%c0_23, %c0_24], %197 {strides = array<i32>} : memref<4x128xf32, #tpu.memory_space<vmem>>, vector<4x128xf32>,
    return
  }
  func.func @transform_0(%arg0: i32) -> (i32, i32) {
    %c0_i32 = arith.constant 0 : i32
    %c0_i32_0 = arith.constant 0 : i32
    return %c0_i32, %arg0 : i32, i32
  }
  func.func @transform_1(%arg0: i32) -> (i32, i32) {
    %c0_i32 = arith.constant 0 : i32
    %c0_i32_0 = arith.constant 0 : i32
    %c0_i32_1 = arith.constant 0 : i32
    return %c0_i32, %c0_i32_0 : i32, i32
  }
  func.func @transform_2(%arg0: i32) -> (i32, i32) {
    %c0_i32 = arith.constant 0 : i32
    %c0_i32_0 = arith.constant 0 : i32
    %c0_i32_1 = arith.constant 0 : i32
    return %c0_i32, %c0_i32_0 : i32, i32
  }
  func.func @transform_3(%arg0: i32) -> (i32, i32) {
    %c0_i32 = arith.constant 0 : i32
    %c0_i32_0 = arith.constant 0 : i32
    %c0_i32_1 = arith.constant 0 : i32
    return %c0_i32, %c0_i32_0 : i32, i32
  }
  func.func @transform_4(%arg0: i32) -> (i32, i32) {
    %c0_i32 = arith.constant 0 : i32
    %c0_i32_0 = arith.constant 0 : i32
    %c0_i32_1 = arith.constant 0 : i32
    return %c0_i32, %c0_i32_0 : i32, i32
  }
  func.func @transform_5(%arg0: i32) -> (i32, i32) {
    %c0_i32 = arith.constant 0 : i32
    %c0_i32_0 = arith.constant 0 : i32
    %c0_i32_1 = arith.constant 0 : i32
    return %c0_i32, %c0_i32_0 : i32, i32
  }
  func.func @transform_6(%arg0: i32) -> (i32, i32) {
    %c0_i32 = arith.constant 0 : i32
    %c0_i32_0 = arith.constant 0 : i32
    %c0_i32_1 = arith.constant 0 : i32
    return %c0_i32, %c0_i32_0 : i32, i32
  }
  func.func @transform_7(%arg0: i32) -> (i32, i32) {
    %c0_i32 = arith.constant 0 : i32
    %c0_i32_0 = arith.constant 0 : i32
    %c0_i32_1 = arith.constant 0 : i32
    return %c0_i32, %c0_i32_0 : i32, i32
  }
  func.func @transform_8(%arg0: i32) -> (i32, i32) {
    %c0_i32 = arith.constant 0 : i32
    %c0_i32_0 = arith.constant 0 : i32
    %c0_i32_1 = arith.constant 0 : i32
    return %c0_i32, %c0_i32_0 : i32, i32
  }
  func.func @transform_9(%arg0: i32) -> (i32, i32) {
    %c0_i32 = arith.constant 0 : i32
    %c0_i32_0 = arith.constant 0 : i32
    return %c0_i32, %arg0 : i32, i32
  }
}

</mosaic_0001>

<bundles_post_ra>
// kernel: tpu_custom_call.1
= control target key start
LH: loop header
LB: loop body
LE: loop exit
PB: predicated region body
PF: predicated region fallthrough
CT: control target
= control target key end

     0   :  { %14 = vsyncpa [#allocation3], 0  ;;  %s794_s0 = inlined_call_operand.vmem [shape: f32[32,128], index: 0, kind: input, shape index: {}]   ;;  %s795_s1 = inlined_call_operand.hbm [shape: f32[16,32], index: 1, kind: input, shape index: {}]   ;;  %s796_s2 = inlined_call_operand.vmem [shape: f32[16,1], index: 2, kind: input, shape index: {}]   ;;  %s797_s3 = inlined_call_operand.vmem [shape: f32[6,16], index: 3, kind: input, shape index: {}]   ;;  %s798_s4 = inlined_call_operand.vmem [shape: f32[6,1], index: 4, kind: input, shape index: {}]   ;;  %s799_s5 = inlined_call_operand.vmem [shape: f32[3,6], index: 5, kind: input, shape index: {}]   ;;  %s800_s6 = inlined_call_operand.vmem [shape: f32[3,1], index: 6, kind: input, shape index: {}]   ;;  %s801_s7 = inlined_call_operand.vmem [shape: f32[4,3], index: 7, kind: input, shape index: {}]   ;;  %s802_s8 = inlined_call_operand.vmem [shape: f32[4,1], index: 8, kind: input, shape index: {}]   ;;  %s803_s9 = inlined_call_operand.hbm [shape: f32[4,128], index: 9, kind: output, shape index: {}]  }
   0x1   :  { %15 = vsyncpa [#allocation4], 0  ;;  %s628_s30 = smov [#allocation2]  }
   0x2   :  { %s23_s10 = sshll.u32 %s628_s30, 4  ;;  %s24_s10 = int_to_ptr.vmem [resolvable:$true] %s23_s10 }
   0x3   :  { %s592_s11 = scalar_lea.vmem %s24_s10, 256  ;;  %p597_p1 = scmp.lt.s32.totalorder %s24_s10, %s24_s10 }
   0x4   :  { %p593_p0 = scmp.ne.s32.totalorder %s24_s10, %s592_s11  ;;  %p598_p2 = scmp.lt.s32.totalorder %s592_s11, %s592_s11 }
   0x6   :  { %p599_p3 = por %p598_p2, %p597_p1 }
   0x8   :  { %p600_p4 = pnand %p599_p3, %p593_p0 }
   0xa   :  { %603 = shalt.err (!%p600_p4)
}
   0xb   :  { %s629_s12 = smov 128   ;;  %s630_s13 = smov 8  }
   0xc   :  { %29 = dma.hbm_to_vmem [thread:$0]  %s795_s1, 256, %s24_s10, [#allocation3], %s629_s12, %s629_s12, %s630_s13  }
   0xd   :  { %624 = dma.done.wait [#allocation3], 256  }
   0xe   :  { %625 = vsyncadd [#allocation3], 4294967040  ;;  %v631_v0 = vmov 0   ;;  %vm65_vm0 = vcmask 261120   ;;  %v50_v1 = vld [vmem:[%s794_s0 + $0x18] sm:$0xff]  ;;  %v49_v2 = vld [vmem:[%s794_s0 + $0x10] sm:$0xff]  ;;  %v183_v61 = vlaneseq }
   0xf   :  { %542 = vset.pattern.permute.xlu0 %v631_v0  ;;  %543 = vset.pattern.permute.xlu1 %v631_v0  ;;  %v51_v3 = vld [vmem:[#allocation2] sm:$0xff]  ;;  %v48_v4 = vld [vmem:[%s794_s0 + $0x8] sm:$0xff]  ;;  %v632_v11 = vmov 1   ;;  %v633_v12 = vmov 2   ;;  %v634_v13 = vmov 4   ;;  %v635_v14 = vmov 3  }
  0x10   :  { %511 = vmatprep.subr.mxu0 %v50_v1  ;;  %519 = vmatprep.mubr.msk.f32.mxu0 %vm65_vm0, %v51_v3  ;;  %v53_v5 = vld [vmem:[%s796_s2] sm:$0xff]  ;;  %v54_v8 = vld [vmem:[%s796_s2 + $0x8] sm:$0xff]  ;;  %v636_v15 = vmov 7   ;;  %v637_v16 = vmov 5   ;;  %v638_v17 = vmov 10   ;;  %v639_v18 = vmov 6  }
  0x11   :  { %512 = vmatpush3.msra.mxu0 %v50_v1  ;;  %v171_v6 = vld [vmem:[%s797_s3] sm:$0x3f]  ;;  %57 = vperm.xlu0 %542, %v53_v5   ;;  %v52_v10 = vld [vmem:[#allocation2 + $0x8] sm:$0xff]  ;;  %v640_v19 = vmov 13   ;;  %v641_v20 = vmov 8   ;;  %v642_v21 = vmov 9  }
  0x12   :  { %513 = vmatprep.subr.mxu0 %v49_v2  ;;  %v47_v7 = vld [vmem:[%s794_s0] sm:$0xff]  ;;  %180 = vperm.xlu1 %543, %v171_v6   ;;  %v643_v22 = vmov 11   ;;  %v644_v23 = vmov 12   ;;  %v645_v24 = vmov 14   ;;  %v646_v25 = vmov 15  }
  0x13   :  { %514 = vmatpush3.msra.mxu0 %v49_v2  ;;  %v172_v9 = vld [vmem:[%s798_s4] sm:$0x3f]  ;;  %v748_v62 = vshrl.u32 %v183_v61, 7  ;;  %vm339_vm1 = vcmask 1045504   ;;  %vm428_vm2 = vcmask 1042432  }
  0x14   :  { %515 = vmatprep.subr.mxu0 %v48_v4  ;;  %v361_v26 = vld [vmem:[%s800_s6] sm:$0x7] }
  0x15   :  { %516 = vmatpush3.msra.mxu0 %v48_v4  ;;  %62 = vperm.xlu0 %542, %v54_v8   ;;  %v360_v27 = vld [vmem:[%s799_s5] sm:$0x7]  ;;  %v751_v2 = vsub.s32 0, %v748_v62  ;;  %v754_v3 = vsub.s32 1, %v748_v62  ;;  %v757_v5 = vsub.s32 2, %v748_v62  ;;  %v761_v8 = vsub.s32 3, %v748_v62 }
  0x16   :  { %517 = vmatprep.subr.mxu0 %v47_v7  ;;  %175 = vperm.xlu1 %543, %v172_v9   ;;  %v449_v28 = vld [vmem:[%s801_s7] sm:$0xf]  ;;  %s647_s7 = smov [#allocation5]  }
  0x17   :  { %518 = vmatpush3.msra.mxu0 %v47_v7  ;;  %v450_v30 = vld [vmem:[%s802_s8] sm:$0xf]  ;;  %s494_s8 = sshll.u32 %s647_s7, 4  ;;  %s495_s8 = int_to_ptr.vmem [resolvable:$true] %s494_s8 }
  0x18   :  { %520 = vmatmul.mubr.msk.f32.vlgmr.msra.gmra.mxu0 %vm65_vm0, %v52_v10  ;;  %s604_s12 = scalar_lea.vmem %s495_s8, 64  ;;  %p609_p6 = scmp.lt.s32.totalorder %s495_s8, %s495_s8 }
  0x19   :  { %544 = vset.pattern.permute.xlu0 %v632_v11  ;;  %p605_p5 = scmp.ne.s32.totalorder %s495_s8, %s604_s12  ;;  %p610_p7 = scmp.lt.s32.totalorder %s604_s12, %s604_s12 }
  0x1a   :  { %545 = vset.pattern.permute.xlu1 %v633_v12  ;;  %190 = vperm.xlu0 %544, %v171_v6  }
  0x1b   :  { %200 = vperm.xlu1 %545, %v171_v6   ;;  %p611_p8 = por %p610_p7, %p609_p6 }
  0x1d   :  { %p612_p9 = pnand %p611_p8, %p605_p5 }
  0x1e   :  { %547 = vset.pattern.permute.xlu0 %v634_v13 }
  0x1f   :  { %546 = vset.pattern.permute.xlu1 %v635_v14  ;;  %220 = vperm.xlu0 %547, %v171_v6  }
  0x20   :  { %210 = vperm.xlu1 %546, %v171_v6  }
  0x23   :  { %550 = vset.pattern.permute.xlu0 %v636_v15 }
  0x24   :  { %548 = vset.pattern.permute.xlu1 %v637_v16  ;;  %250 = vperm.xlu0 %550, %v171_v6  }
  0x25   :  { %230 = vperm.xlu1 %548, %v171_v6  }
  0x28   :  { %553 = vset.pattern.permute.xlu0 %v638_v17 }
  0x29   :  { %549 = vset.pattern.permute.xlu1 %v639_v18  ;;  %280 = vperm.xlu0 %553, %v171_v6  }
  0x2a   :  { %240 = vperm.xlu1 %549, %v171_v6  }
  0x2d   :  { %556 = vset.pattern.permute.xlu0 %v640_v19 }
  0x2e   :  { %551 = vset.pattern.permute.xlu1 %v641_v20  ;;  %310 = vperm.xlu0 %556, %v171_v6   ;;  %v245_v20 = vsub.s32 6, %v748_v62 }
  0x2f   :  { %260 = vperm.xlu1 %551, %v171_v6  }
  0x32   :  { %559 = vset.pattern.permute.xlu0 %v631_v0 }
  0x33   :  { %552 = vset.pattern.permute.xlu1 %v642_v21  ;;  %369 = vperm.xlu0 %559, %v360_v27  }
  0x34   :  { %270 = vperm.xlu1 %552, %v171_v6  }
  0x37   :  { %562 = vset.pattern.permute.xlu0 %v633_v12 }
  0x38   :  { %554 = vset.pattern.permute.xlu1 %v643_v22  ;;  %389 = vperm.xlu0 %562, %v360_v27  }
  0x39   :  { %290 = vperm.xlu1 %554, %v171_v6  }
  0x3c   :  { %565 = vset.pattern.permute.xlu0 %v637_v16  ;;  %v770_v16 = vsub.s32 5, %v748_v62 }
  0x3d   :  { %555 = vset.pattern.permute.xlu1 %v644_v23  ;;  %419 = vperm.xlu0 %565, %v360_v27  }
  0x3e   :  { %300 = vperm.xlu1 %555, %v171_v6  }
  0x41   :  { %567 = vset.pattern.permute.xlu0 %v632_v11 }
  0x42   :  { %557 = vset.pattern.permute.xlu1 %v645_v24  ;;  %468 = vperm.xlu0 %567, %v449_v28  }
  0x43   :  { %320 = vperm.xlu1 %557, %v171_v6  }
  0x46   :  { %569 = vset.pattern.permute.xlu0 %v633_v12 }
  0x47   :  { %558 = vset.pattern.permute.xlu1 %v646_v25 }
  0x48   :  { %330 = vperm.xlu1 %558, %v171_v6  }
  0x4c   :  { %560 = vset.pattern.permute.xlu1 %v631_v0 }
  0x4d   :  { %364 = vperm.xlu1 %560, %v361_v26  }
  0x51   :  { %561 = vset.pattern.permute.xlu1 %v632_v11 }
  0x52   :  { %379 = vperm.xlu1 %561, %v360_v27  }
  0x56   :  { %563 = vset.pattern.permute.xlu1 %v635_v14 }
  0x57   :  { %399 = vperm.xlu1 %563, %v360_v27  }
  0x5b   :  { %564 = vset.pattern.permute.xlu1 %v634_v13  ;;  %v766_v13 = vsub.s32 4, %v748_v62 }
  0x5c   :  { %409 = vperm.xlu1 %564, %v360_v27   ;;  %v255_v27 = vsub.s32 7, %v748_v62 }
  0x60   :  { %566 = vset.pattern.permute.xlu1 %v631_v0 }
  0x61   :  { %458 = vperm.xlu1 %566, %v449_v28  }
  0x65   :  { %453 = vperm.xlu1 %566, %v450_v30  }
  0x69   :  { %568 = vset.pattern.permute.xlu1 %v633_v12 }
  0x6a   :  { %478 = vperm.xlu1 %568, %v449_v28  }
  0x8c   :  { %v58_v29 = vpop.permute.xlu0 %57 }
  0x8d   :  { %v181_v47 = vpop.permute.xlu1 %180 }
  0x90   :  { %v63_v32 = vpop.permute.xlu0 %62 }
  0x91   :  { %v176_v51 = vpop.permute.xlu1 %175 }
  0x95   :  { %v191_v9 = vpop.permute.xlu0 %190 }
  0x96   :  { %v201_v55 = vpop.permute.xlu1 %200 }
  0x9a   :  { %v221_v23 = vpop.permute.xlu0 %220 }
  0x9b   :  { %v211_v59 = vpop.permute.xlu1 %210 }
  0xa0   :  { %v231_v60 = vpop.permute.xlu1 %230 }
  0xa5   :  { %v241_v63 = vpop.permute.xlu1 %240 }
  0xaa   :  { %v261_v6 = vpop.permute.xlu1 %260 }
  0xaf   :  { %v271_v18 = vpop.permute.xlu1 %270 }
  0xd8   :  { %v521_v31 = vpop.f32.mrf.mxu0 }
  0xd9   :  { %v144_v34 = vadd.f32 %v521_v31, %v63_v32  ;;  %v291_v32 = vpop.permute.xlu1 %290 }
  0xda   :  { %v138_v33 = vpop.f32.mrf.mxu0 }
  0xdb   :  { %v139_v35 = vadd.f32 %v138_v33, %v58_v29 }
  0xdd   :  { %v147_v36 = vmax.f32 %v139_v35, %v144_v34 }
  0xdf   :  { %v148_v37 = vrot.slane %v147_v36, 4 }
  0xe1   :  { %v149_v38 = vmax.f32 %v147_v36, %v148_v37  ;;  %v251_v36 = vpop.permute.xlu0 %250 }
  0xe3   :  { %v150_v39 = vrot.slane %v149_v38, 2 }
  0xe5   :  { %v151_v40 = vmax.f32 %v149_v38, %v150_v39 }
  0xe7   :  { %v152_v41 = vrot.slane %v151_v40, 1 }
  0xe9   :  { %v153_v42 = vmax.f32 %v151_v40, %v152_v41 }
  0xeb   :  { %v154_v43 = vsub.f32 %v139_v35, %v153_v42  ;;  %v155_v44 = vsub.f32 %v144_v34, %v153_v42 }
  0xed   :  { %v156_v45 = vmul.f32 1.442695, %v154_v43  ;;  %v158_v46 = vmul.f32 1.442695, %v155_v44 }
  0xef   :  { %570 = vpow2.f32 %v156_v45 }
  0xf0   :  { %572 = vpow2.f32 %v158_v46 }
  0xfc   :  { %v571_v48 = vpop.eup %570 }
  0xfd   :  { %v573_v49 = vpop.eup %572 }
  0xfe   :  { %v160_v50 = vadd.f32 %v573_v49, %v571_v48 }
 0x100   :  { %v161_v52 = vrot.slane %v160_v50, 4 }
 0x102   :  { %v162_v53 = vadd.f32 %v161_v52, %v160_v50 }
 0x104   :  { %v163_v54 = vrot.slane %v162_v53, 2 }
 0x106   :  { %v164_v56 = vadd.f32 %v163_v54, %v162_v53 }
 0x108   :  { %v165_v57 = vrot.slane %v164_v56, 1 }
 0x10a   :  { %v166_v58 = vadd.f32 %v165_v57, %v164_v56 }
 0x10c   :  { %574 = vlog2.f32 %v166_v58 }
 0x119   :  { %v575_v0 = vpop.eup %574 }
 0x11a   :  { %v168_v1 = vmul.f32 0.6931472, %v575_v0 }
 0x11c   :  { %v169_v4 = vsub.f32 %v154_v43, %v168_v1  ;;  %v170_v28 = vsub.f32 %v155_v44, %v168_v1  ;;  %v301_v43 = vpop.permute.xlu1 %300 }
 0x11e   :  { %v186_v7 = vrot.slane %v169_v4, %v751_v2  ;;  %v196_v10 = vrot.slane %v169_v4, %v754_v3  ;;  %v206_v12 = vrot.slane %v169_v4, %v757_v5  ;;  %v216_v15 = vrot.slane %v169_v4, %v761_v8 }
 0x11f   :  { %v226_v22 = vrot.slane %v169_v4, %v766_v13  ;;  %v236_v25 = vrot.slane %v169_v4, %v770_v16  ;;  %v246_v29 = vrot.slane %v169_v4, %v245_v20  ;;  %v256_v35 = vrot.slane %v169_v4, %v255_v27 }
 0x120   :  { %v187_v11 = vmul.f32 %v186_v7, %v181_v47  ;;  %v197_v17 = vmul.f32 %v196_v10, %v191_v9  ;;  %v207_v19 = vmul.f32 %v206_v12, %v201_v55  ;;  %v217_v24 = vmul.f32 %v216_v15, %v211_v59  ;;  %v281_v47 = vpop.permute.xlu0 %280  ;;  %v321_v54 = vpop.permute.xlu1 %320 }
 0x121   :  { %v227_v31 = vmul.f32 %v226_v22, %v221_v23  ;;  %v237_v33 = vmul.f32 %v236_v25, %v231_v60  ;;  %v247_v37 = vmul.f32 %v246_v29, %v241_v63  ;;  %v266_v38 = vrot.slane %v170_v28, %v751_v2 }
 0x122   :  { %v188_v14 = vadd.f32 %v187_v11, %v176_v51  ;;  %v276_v40 = vrot.slane %v170_v28, %v754_v3  ;;  %v257_v42 = vmul.f32 %v256_v35, %v251_v36  ;;  %v286_v44 = vrot.slane %v170_v28, %v757_v5 }
 0x123   :  { %v267_v45 = vmul.f32 %v266_v38, %v261_v6  ;;  %v296_v49 = vrot.slane %v170_v28, %v761_v8  ;;  %v306_v51 = vrot.slane %v170_v28, %v766_v13  ;;  %v316_v57 = vrot.slane %v170_v28, %v770_v16 }
 0x124   :  { %v198_v21 = vadd.f32 %v197_v17, %v188_v14  ;;  %v277_v48 = vmul.f32 %v276_v40, %v271_v18  ;;  %v287_v53 = vmul.f32 %v286_v44, %v281_v47  ;;  %v311_v58 = vpop.permute.xlu0 %310  ;;  %v326_v60 = vrot.slane %v170_v28, %v245_v20  ;;  %v331_v1 = vpop.permute.xlu1 %330 }
 0x125   :  { %v297_v55 = vmul.f32 %v296_v49, %v291_v32  ;;  %v307_v59 = vmul.f32 %v306_v51, %v301_v43  ;;  %v336_v62 = vrot.slane %v170_v28, %v255_v27  ;;  %v317_v0 = vmul.f32 %v316_v57, %v311_v58 }
 0x126   :  { %v208_v26 = vadd.f32 %v207_v19, %v198_v21  ;;  %v327_v4 = vmul.f32 %v326_v60, %v321_v54 }
 0x127   :  { %v337_v7 = vmul.f32 %v336_v62, %v331_v1 }
 0x128   :  { %v218_v30 = vadd.f32 %v217_v24, %v208_v26 }
 0x12a   :  { %v228_v34 = vadd.f32 %v227_v31, %v218_v30  ;;  %v365_v30 = vpop.permute.xlu1 %364 }
 0x12c   :  { %v238_v39 = vadd.f32 %v237_v33, %v228_v34  ;;  %v370_v34 = vpop.permute.xlu0 %369 }
 0x12e   :  { %v248_v41 = vadd.f32 %v247_v37, %v238_v39  ;;  %v380_v32 = vpop.permute.xlu1 %379 }
 0x130   :  { %v258_v46 = vadd.f32 %v257_v42, %v248_v41  ;;  %v390_v41 = vpop.permute.xlu0 %389 }
 0x132   :  { %v268_v50 = vadd.f32 %v267_v45, %v258_v46  ;;  %v400_v38 = vpop.permute.xlu1 %399 }
 0x134   :  { %v278_v52 = vadd.f32 %v277_v48, %v268_v50 }
 0x136   :  { %v288_v56 = vadd.f32 %v287_v53, %v278_v52  ;;  %v410_v48 = vpop.permute.xlu1 %409  ;;  %v420_v52 = vpop.permute.xlu0 %419 }
 0x138   :  { %v298_v61 = vadd.f32 %v297_v55, %v288_v56 }
 0x13a   :  { %v308_v63 = vadd.f32 %v307_v59, %v298_v61 }
 0x13c   :  { %v318_v6 = vadd.f32 %v317_v0, %v308_v63 }
 0x13e   :  { %v328_v9 = vadd.f32 %v327_v4, %v318_v6 }
 0x140   :  { %v338_v10 = vadd.f32 %v337_v7, %v328_v9 }
 0x142   :  { %v340_v11 = vsel %vm339_vm1, %v338_v10, -inf }
 0x143   :  { %v341_v12 = vrot.slane %v340_v11, 4 }
 0x145   :  { %v342_v14 = vmax.f32 %v340_v11, %v341_v12  ;;  %v459_v12 = vpop.permute.xlu1 %458 }
 0x147   :  { %v343_v15 = vrot.slane %v342_v14, 2 }
 0x149   :  { %v344_v17 = vmax.f32 %v342_v14, %v343_v15 }
 0x14b   :  { %v345_v18 = vrot.slane %v344_v17, 1 }
 0x14d   :  { %v346_v19 = vmax.f32 %v344_v17, %v345_v18  ;;  %v454_v17 = vpop.permute.xlu1 %453 }
 0x14f   :  { %v347_v21 = vsub.f32 %v338_v10, %v346_v19 }
 0x151   :  { %v348_v20 = vmul.f32 1.442695, %v347_v21 }
 0x153   :  { %576 = vpow2.f32 %v348_v20  ;;  %v469_v20 = vpop.permute.xlu0 %468 }
 0x160   :  { %v577_v22 = vpop.eup %576 }
 0x161   :  { %v350_v23 = vsel %vm339_vm1, %v577_v22, 0.0 }
 0x162   :  { %v351_v24 = vrot.slane %v350_v23, 4 }
 0x164   :  { %v352_v25 = vadd.f32 %v351_v24, %v350_v23  ;;  %v479_v24 = vpop.permute.xlu1 %478 }
 0x166   :  { %v353_v26 = vrot.slane %v352_v25, 2 }
 0x168   :  { %v354_v27 = vadd.f32 %v353_v26, %v352_v25 }
 0x16a   :  { %v355_v28 = vrot.slane %v354_v27, 1 }
 0x16c   :  { %v356_v29 = vadd.f32 %v355_v28, %v354_v27 }
 0x16e   :  { %578 = vlog2.f32 %v356_v29 }
 0x17b   :  { %v579_v31 = vpop.eup %578 }
 0x17c   :  { %v358_v33 = vmul.f32 0.6931472, %v579_v31 }
 0x17e   :  { %v359_v35 = vsub.f32 %v347_v21, %v358_v33 }
 0x180   :  { %v385_v36 = vrot.slane %v359_v35, %v754_v3  ;;  %v375_v37 = vrot.slane %v359_v35, %v751_v2  ;;  %v395_v40 = vrot.slane %v359_v35, %v757_v5  ;;  %v405_v45 = vrot.slane %v359_v35, %v761_v8 }
 0x181   :  { %v415_v47 = vrot.slane %v359_v35, %v766_v13  ;;  %v425_v51 = vrot.slane %v359_v35, %v770_v16 }
 0x182   :  { %v376_v39 = vmul.f32 %v375_v37, %v370_v34  ;;  %v386_v42 = vmul.f32 %v385_v36, %v380_v32  ;;  %v396_v44 = vmul.f32 %v395_v40, %v390_v41  ;;  %v406_v49 = vmul.f32 %v405_v45, %v400_v38 }
 0x183   :  { %v416_v54 = vmul.f32 %v415_v47, %v410_v48  ;;  %v426_v56 = vmul.f32 %v425_v51, %v420_v52 }
 0x184   :  { %v377_v43 = vadd.f32 %v376_v39, %v365_v30 }
 0x186   :  { %v387_v46 = vadd.f32 %v386_v42, %v377_v43 }
 0x188   :  { %v397_v50 = vadd.f32 %v396_v44, %v387_v46 }
 0x18a   :  { %v407_v53 = vadd.f32 %v406_v49, %v397_v50 }
 0x18c   :  { %v417_v55 = vadd.f32 %v416_v54, %v407_v53 }
 0x18e   :  { %v427_v57 = vadd.f32 %v426_v56, %v417_v55 }
 0x190   :  { %v429_v58 = vsel %vm428_vm2, %v427_v57, -inf }
 0x191   :  { %v430_v59 = vrot.slane %v429_v58, 4 }
 0x193   :  { %v431_v60 = vmax.f32 %v429_v58, %v430_v59 }
 0x195   :  { %v432_v8 = vrot.slane %v431_v60, 2 }
 0x197   :  { %v433_v61 = vmax.f32 %v431_v60, %v432_v8 }
 0x199   :  { %v434_v62 = vrot.slane %v433_v61, 1 }
 0x19b   :  { %v435_v63 = vmax.f32 %v433_v61, %v434_v62 }
 0x19d   :  { %v436_v13 = vsub.f32 %v427_v57, %v435_v63 }
 0x19f   :  { %v437_v0 = vmul.f32 1.442695, %v436_v13 }
 0x1a1   :  { %580 = vpow2.f32 %v437_v0 }
 0x1ae   :  { %v581_v1 = vpop.eup %580 }
 0x1af   :  { %v439_v4 = vsel %vm428_vm2, %v581_v1, 0.0 }
 0x1b0   :  { %v440_v16 = vrot.slane %v439_v4, 4 }
 0x1b2   :  { %v441_v6 = vadd.f32 %v440_v16, %v439_v4 }
 0x1b4   :  { %v442_v7 = vrot.slane %v441_v6, 2 }
 0x1b6   :  { %v443_v9 = vadd.f32 %v442_v7, %v441_v6 }
 0x1b8   :  { %v444_v10 = vrot.slane %v443_v9, 1 }
 0x1ba   :  { %v445_v11 = vadd.f32 %v444_v10, %v443_v9 }
 0x1bc   :  { %582 = vlog2.f32 %v445_v11 }
 0x1c9   :  { %v583_v14 = vpop.eup %582 }
 0x1ca   :  { %v447_v15 = vmul.f32 0.6931472, %v583_v14 }
 0x1cc   :  { %v448_v18 = vsub.f32 %v436_v13, %v447_v15 }
 0x1ce   :  { %v464_v19 = vrot.slane %v448_v18, %v751_v2  ;;  %v474_v21 = vrot.slane %v448_v18, %v754_v3  ;;  %v484_v23 = vrot.slane %v448_v18, %v757_v5 }
 0x1d0   :  { %v465_v22 = vmul.f32 %v464_v19, %v459_v12  ;;  %v475_v26 = vmul.f32 %v474_v21, %v469_v20  ;;  %v485_v27 = vmul.f32 %v484_v23, %v479_v24 }
 0x1d2   :  { %v466_v25 = vadd.f32 %v465_v22, %v454_v17 }
 0x1d4   :  { %v476_v28 = vadd.f32 %v475_v26, %v466_v25 }
 0x1d6   :  { %v486_v29 = vadd.f32 %v485_v27, %v476_v28 }
 0x1d8   :  { %487 = vst [vmem:[#allocation5] sm:$0xf] %v486_v29 }
 0x1d9   :  { %615 = shalt.err (!%p612_p9)
}
 0x1da   :  { %497 = dma.vmem_to_hbm [thread:$0]  %s495_s8, 64, %s803_s9, [#allocation4]  }
 0x1db   :  { %626 = dma.done.wait [#allocation4], 64  }
 0x1dc   :  { %627 = vsyncadd [#allocation4], 4294967232 }
 0x1dd   :  { %501 = vsyncpa [#allocation3], 1 }
 0x1de   :  { %502 = vsyncpa [#allocation4], 1 }

</bundles_post_ra>
